<compile_context>
chip_gen: v6e
topology: v6e:2x2x1
jax: 0.10.0
libtpu: 0.0.40
codegen_flags: <defaults>
</compile_context>

<pallas_src>
import jax
import jax.numpy as jnp
from jax.experimental import pallas as pl
from jax.experimental.pallas import tpu as pltpu


def _round_up(a: int, b: int) -> int:
    return ((a + b - 1) // b) * b


def _agent_mlp_kernel(x_ref, w1_ref, b1_ref, w2_ref, b2_ref, out_ref):
    # x streamed in f32; cast to bf16 in-kernel (MXU fast path), f32 accumulate.
    x = x_ref[...].astype(jnp.bfloat16)
    h = jnp.dot(x, w1_ref[...], preferred_element_type=jnp.float32)
    h = jnp.tanh(h + b1_ref[...])                      # f32 bias add + tanh (VPU/EUP)
    logits = jnp.dot(h.astype(w2_ref.dtype), w2_ref[...],
                     preferred_element_type=jnp.float32)
    out_ref[...] = (logits + b2_ref[...]).astype(out_ref.dtype)


def prepare_params(w1, b1, w2, b2):
    """Pad feature dims to 128 lanes + cast matmul weights to bf16, ONCE.

    Call at agent init / after each optimizer step; the padded params are then
    reused by every agent_forward call (no per-call param passes).
    Zero padding is exact: padded hidden cols give tanh(0)=0, padded action
    cols give 0 logits which are sliced off.
    """
    obs_dim, hidden = w1.shape
    n_actions = w2.shape[1]
    hid_p = _round_up(hidden, 128)
    act_p = _round_up(n_actions, 128)

    w1p = jnp.zeros((obs_dim, hid_p), jnp.bfloat16)
    w1p = w1p.at[:, :hidden].set(w1.astype(jnp.bfloat16))
    b1p = jnp.zeros((1, hid_p), jnp.float32).at[:, :hidden].set(b1.reshape(1, -1))
    w2p = jnp.zeros((hid_p, act_p), jnp.bfloat16)
    w2p = w2p.at[:hidden, :n_actions].set(w2.astype(jnp.bfloat16))
    b2p = jnp.zeros((1, act_p), jnp.float32).at[:, :n_actions].set(b2.reshape(1, -1))
    return (w1p, b1p, w2p, b2p), n_actions


def agent_forward(x, padded_params, n_actions, *, block_batch: int = 512):
    """Pallas forward: x [B, obs_dim] (f32) -> action logits [B, n_actions] (f32)."""
    w1p, b1p, w2p, b2p = padded_params
    batch, obs_dim = x.shape
    hid_p = w1p.shape[1]
    act_p = w2p.shape[1]

    # Batch tile: big enough to amortize ~0.35us/step overhead, but always
    # >=2 grid steps (when batch allows) so v7x's two TensorCores both get work.
    tb = min(block_batch, _round_up(batch, 8))
    if batch > 8:
        tb = min(tb, _round_up((batch + 1) // 2, 8))
    tb = max(tb, 8)

    batch_p = _round_up(batch, tb)
    if batch_p != batch:
        # Only touches x when tb doesn't divide batch (rare at RL batch sizes).
        x = jnp.pad(x, ((0, batch_p - batch), (0, 0)))

    grid = (batch_p // tb,)

    # Explicit VMEM budget: 2x streamed tiles (x, out) + single-buffered
    # resident weights/biases + f32 intermediates, with 2x headroom.
    est = (2 * tb * obs_dim * x.dtype.itemsize       # double-buffered obs tiles
           + 2 * tb * act_p * 4                       # double-buffered out tiles
           + w1p.size * 2 + w2p.size * 2              # resident bf16 weights
           + (hid_p + act_p) * 4                      # resident f32 biases
           + tb * hid_p * 4 + tb * act_p * 4)         # f32 h / logits intermediates
    vmem_limit = int(min(64 * 1024 * 1024, max(32 * 1024 * 1024, 2 * est)))

    out_padded = pl.pallas_call(
        _agent_mlp_kernel,
        out_shape=jax.ShapeDtypeStruct((batch_p, act_p), jnp.float32),
        grid=grid,
        in_specs=[
            # Streamed f32 obs tiles: full-extent last dim (== obs_dim), no padding.
            pl.BlockSpec((tb, obs_dim), lambda i: (i, 0)),
            # Resident params: constant index_map, DMA'd once, single-buffered.
            pl.BlockSpec((obs_dim, hid_p), lambda i: (0, 0),
                         pipeline_mode=pl.Buffered(1)),
            pl.BlockSpec((1, hid_p), lambda i: (0, 0),
                         pipeline_mode=pl.Buffered(1)),
            pl.BlockSpec((hid_p, act_p), lambda i: (0, 0),
                         pipeline_mode=pl.Buffered(1)),
            pl.BlockSpec((1, act_p), lambda i: (0, 0),
                         pipeline_mode=pl.Buffered(1)),
        ],
        out_specs=pl.BlockSpec((tb, act_p), lambda i: (i, 0)),
        compiler_params=pltpu.CompilerParams(
            dimension_semantics=("parallel",),
            vmem_limit_bytes=vmem_limit,
        ),
    )(x, w1p, b1p, w2p, b2p)

    return out_padded[:batch, :n_actions]


def init_params(key, obs_dim, hidden_dim, n_actions):
    """Deterministic synthetic parameter init (2-layer MLP policy head)."""
    k1, k2 = jax.random.split(key)
    w1 = jax.random.normal(k1, (obs_dim, hidden_dim), jnp.float32) * 0.1
    b1 = jnp.zeros((1, hidden_dim), jnp.float32)
    w2 = jax.random.normal(k2, (hidden_dim, n_actions), jnp.float32) * 0.1
    b2 = jnp.zeros((1, n_actions), jnp.float32)
    return w1, b1, w2, b2


def reference_forward(x, w1, b1, w2, b2):
    # Same mixed-precision policy as the kernel (bf16 matmul inputs, f32 acc).
    h = jnp.dot(x.astype(jnp.bfloat16), w1.astype(jnp.bfloat16),
                preferred_element_type=jnp.float32) + b1
    h = jnp.tanh(h)
    logits = jnp.dot(h.astype(jnp.bfloat16), w2.astype(jnp.bfloat16),
                     preferred_element_type=jnp.float32) + b2
    return logits


if __name__ == "__main__":
    key = jax.random.PRNGKey(0)
    k_x, k_p = jax.random.split(key)

    # Small but multi-tile shapes (grid of 2 batch blocks of 128 rows).
    batch, obs_dim, hidden_dim, n_actions = 256, 32, 64, 16
    x = jax.random.normal(k_x, (batch, obs_dim), jnp.float32)
    w1, b1, w2, b2 = init_params(k_p, obs_dim, hidden_dim, n_actions)

    # Params padded/cast once, reused across forward calls.
    padded_params, n_act = prepare_params(w1, b1, w2, b2)

    out = agent_forward(x, padded_params, n_act)
    jax.block_until_ready(out)

    ref = reference_forward(x, w1, b1, w2, b2)
    assert out.shape == (batch, n_actions)
    assert jnp.allclose(out, ref, atol=2e-3, rtol=2e-3), (
        float(jnp.max(jnp.abs(out - ref))))

    # Sanity against the pure-f32 math (loose tolerance for bf16 matmul inputs).
    ref_f32 = jnp.tanh(x @ w1 + b1) @ w2 + b2
    assert jnp.allclose(out, ref_f32, atol=5e-2, rtol=5e-2)

    print("KERNEL_OK")
</pallas_src>

<mosaic_0001>
module attributes {stable_mosaic.version = 11 : i64} {
  func.func @_agent_mlp_kernel(%arg0: i32, %arg1: memref<128x32xf32, #tpu.memory_space<vmem>>, %arg2: memref<32x128xbf16, #tpu.memory_space<vmem>>, %arg3: memref<1x128xf32, #tpu.memory_space<vmem>>, %arg4: memref<128x128xbf16, #tpu.memory_space<vmem>>, %arg5: memref<1x128xf32, #tpu.memory_space<vmem>>, %arg6: memref<128x128xf32, #tpu.memory_space<vmem>>) attributes {dimension_semantics = [#tpu.dimension_semantics<parallel>], iteration_bounds = array<i64: 2>, scalar_prefetch = 0 : i64, scratch_operands = 0 : i64, tpu.core_type = #tpu.core_type<tc>, window_params = [{transform_indices = @transform_0, window_bounds = array<i64: 128, 32>}, {pipeline_mode = #tpu.pipeline_mode<synchronous>, transform_indices = @transform_1, window_bounds = array<i64: 32, 128>}, {pipeline_mode = #tpu.pipeline_mode<synchronous>, transform_indices = @transform_2, window_bounds = array<i64: 1, 128>}, {pipeline_mode = #tpu.pipeline_mode<synchronous>, transform_indices = @transform_3, window_bounds = array<i64: 128, 128>}, {pipeline_mode = #tpu.pipeline_mode<synchronous>, transform_indices = @transform_4, window_bounds = array<i64: 1, 128>}, {transform_indices = @transform_5, window_bounds = array<i64: 128, 128>}]} {
    %c0 = arith.constant 0 : index
    %c0_0 = arith.constant 0 : index
    %0 = vector.load %arg1[%c0, %c0_0] : memref<128x32xf32, #tpu.memory_space<vmem>>, vector<128x32xf32>
    %1 = arith.truncf %0 : vector<128x32xf32> to vector<128x32xbf16>
    %c0_1 = arith.constant 0 : index
    %c0_2 = arith.constant 0 : index
    %2 = vector.load %arg2[%c0_1, %c0_2] : memref<32x128xbf16, #tpu.memory_space<vmem>>, vector<32x128xbf16>
    %cst = arith.constant dense<0.000000e+00> : vector<128x128xf32>
    %3 = tpu.matmul %1, %2, %cst {dimension_numbers = #tpu.dot_dimension_numbers<[1], [0], [0], [1], [0, 0, 1, 1], [], []>} : vector<128x32xbf16>, vector<32x128xbf16>, vector<128x128xf32> -> vector<128x128xf32>
    %c0_3 = arith.constant 0 : index
    %c0_4 = arith.constant 0 : index
    %4 = vector.load %arg3[%c0_3, %c0_4] : memref<1x128xf32, #tpu.memory_space<vmem>>, vector<1x128xf32>
    %5 = vector.broadcast %4 : vector<1x128xf32> to vector<128x128xf32>
    %6 = arith.addf %3, %5 : vector<128x128xf32>
    %7 = math.tanh %6 : vector<128x128xf32>
    %8 = arith.truncf %7 : vector<128x128xf32> to vector<128x128xbf16>
    %c0_5 = arith.constant 0 : index
    %c0_6 = arith.constant 0 : index
    %9 = vector.load %arg4[%c0_5, %c0_6] : memref<128x128xbf16, #tpu.memory_space<vmem>>, vector<128x128xbf16>
    %cst_7 = arith.constant dense<0.000000e+00> : vector<128x128xf32>
    %10 = tpu.matmul %8, %9, %cst_7 {dimension_numbers = #tpu.dot_dimension_numbers<[1], [0], [0], [1], [0, 0, 1, 1], [], []>} : vector<128x128xbf16>, vector<128x128xbf16>, vector<128x128xf32> -> vector<128x128xf32>
    %c0_8 = arith.constant 0 : index
    %c0_9 = arith.constant 0 : index
    %11 = vector.load %arg5[%c0_8, %c0_9] : memref<1x128xf32, #tpu.memory_space<vmem>>, vector<1x128xf32>
    %12 = vector.broadcast %11 : vector<1x128xf32> to vector<128x128xf32>
    %13 = arith.addf %10, %12 : vector<128x128xf32>
    %c0_10 = arith.constant 0 : index
    %c0_11 = arith.constant 0 : index
    %14 = vector.load %arg6[%c0_10, %c0_11] : memref<128x128xf32, #tpu.memory_space<vmem>>, vector<128x128xf32>
    tpu.vector_store %arg6[%c0_10, %c0_11], %13 {strides = array<i32>} : memref<128x128xf32, #tpu.memory_space<vmem>>, vector<128x128xf32>,
    return
  }
  func.func @transform_0(%arg0: i32) -> (i32, i32) {
    %c0_i32 = arith.constant 0 : i32
    %c0_i32_0 = arith.constant 0 : i32
    return %arg0, %c0_i32 : i32, i32
  }
  func.func @transform_1(%arg0: i32) -> (i32, i32) {
    %c0_i32 = arith.constant 0 : i32
    %c0_i32_0 = arith.constant 0 : i32
    %c0_i32_1 = arith.constant 0 : i32
    return %c0_i32, %c0_i32_0 : i32, i32
  }
  func.func @transform_2(%arg0: i32) -> (i32, i32) {
    %c0_i32 = arith.constant 0 : i32
    %c0_i32_0 = arith.constant 0 : i32
    %c0_i32_1 = arith.constant 0 : i32
    return %c0_i32, %c0_i32_0 : i32, i32
  }
  func.func @transform_3(%arg0: i32) -> (i32, i32) {
    %c0_i32 = arith.constant 0 : i32
    %c0_i32_0 = arith.constant 0 : i32
    %c0_i32_1 = arith.constant 0 : i32
    return %c0_i32, %c0_i32_0 : i32, i32
  }
  func.func @transform_4(%arg0: i32) -> (i32, i32) {
    %c0_i32 = arith.constant 0 : i32
    %c0_i32_0 = arith.constant 0 : i32
    %c0_i32_1 = arith.constant 0 : i32
    return %c0_i32, %c0_i32_0 : i32, i32
  }
  func.func @transform_5(%arg0: i32) -> (i32, i32) {
    %c0_i32 = arith.constant 0 : i32
    %c0_i32_0 = arith.constant 0 : i32
    return %arg0, %c0_i32 : i32, i32
  }
}

</mosaic_0001>

<bundles_post_ra>
// kernel: tpu_custom_call.1
= control target key start
LH: loop header
LB: loop body
LE: loop exit
PB: predicated region body
PF: predicated region fallthrough
CT: control target
= control target key end

     0   :  { %10 = vsyncpa [#allocation3], 0  ;;  %s1171_s0 = inlined_call_operand.vmem [shape: f32[256,32], index: 0, kind: input, shape index: {}]   ;;  %s1172_s1 = inlined_call_operand.vmem [shape: bf16[32,128], index: 1, kind: input, shape index: {}]   ;;  %s1173_s2 = inlined_call_operand.vmem [shape: f32[1,128], index: 2, kind: input, shape index: {}]   ;;  %s1174_s3 = inlined_call_operand.vmem [shape: bf16[128,128], index: 3, kind: input, shape index: {}]   ;;  %s1175_s4 = inlined_call_operand.vmem [shape: f32[1,128], index: 4, kind: input, shape index: {}]   ;;  %s1176_s5 = inlined_call_operand.hbm [shape: f32[256,128], index: 5, kind: output, shape index: {}]  }
   0x1   :  { %12 = vsyncpa [#allocation3 + $0x1], 0  ;;  %s985_s18 = smov 0   ;;  %s987_s19 = smov 0  }
   0x2   :  { %s989_s20 = smov 0   ;;  %s991_s21 = smov 0  }
   0x3 LB: > { %s1006_s22 = sadd.s32 4294967295, %s950_s21   ;;  %s680_s23 = sadd.s32 4294967294, %s950_s21   ;;  %s950_s21 = sphi %s991_s21, %s1182_s21   ;;  %s946_s20 = sphi %s989_s20, %s1181_s20   ;;  %s942_s19 = sphi %s987_s19, %s1180_s19   ;;  %s938_s18 = sphi %s985_s18, %s1179_s18  }
   0x4   : > { %s1010_s24 = sadd.s32 1, %s950_s21   ;;  %s135_s25 = sadd.s32 1, %s946_s20 }
   0x5   : > { %s132_s26 = ssub.s32 %s950_s21, %s1010_s24  ;;  %p145_p0 = scmp.ne.s32.totalorder %s946_s20, %s942_s19 }
   0x6   : > { %p133_p1 = scmp.eq.s32.totalorder %s132_s26, 0  ;;  %p146_p2 = scmp.eq.s32.totalorder %s1006_s22, 1 }
   0x7   : > { %p151_p3 = scmp.ne.s32.totalorder %s942_s19, %s938_s18  ;;  %p152_p4 = scmp.eq.s32.totalorder %s680_s23, 1 }
   0x8   : > { %s1021_s27 = scalar_select %p133_p1, %s946_s20, %s135_s25  }
   0x9   : > { %p1023_p5 = por %p146_p2, %p145_p0  ;;  %p1027_p6 = por %p152_p4, %p151_p3 }
   0xa   : > { %p683_p7 = scmp.ge.s32.totalorder %s950_s21, 1  ;;  %p191_p8 = scmp.lt.s32.totalorder %s950_s21, 3 }
   0xc   : > { %p192_p9 = pnand %p683_p7, %p191_p8 }
   0xd   : > { %s685_s7 = sshll.u32 (!%p192_p9), %s1006_s22, 4  ;;  %s216_s16 = sand.u32 (!%p192_p9), 1, %s942_s19  }
   0xe   : > { %195 = sbr.rel (%p192_p9) target bundleno = 485 (0x1e5), region = 40  ;;  %p220_p10 = scmp.lt.s32.totalorder (!%p192_p9), %s685_s7, 31 }
   0xf   : > { %s712_s30 = sshll.u32 (!%p192_p9), %s1006_s22, 11  ;;  %s1131_s22 = scalar_lea.sflag (!%p192_p9), [#allocation3], %s216_s16 }
  0x10   : > { %s1123_s9 = scalar_lea.hbm (!%p192_p9), %s1176_s5, %s712_s30  ;;  %s952_s11 = smov (!%p192_p9), [#allocation2]  }
  0x11   : > { %s894_s12 = sshll.u32 (!%p192_p9), %s952_s11, 4  ;;  %s895_s12 = int_to_ptr.vmem [resolvable:$false] %s894_s12 }
  0x12   : > { %s896_s13 = scalar_lea.vmem (!%p192_p9), %s895_s12, 4096 }
  0x13   : > { %v848_v0 = vld [vmem:[%s1172_s1 + $0x8] sm:$0xff]   ;;  %v849_v1 = vld [vmem:[%s1172_s1] sm:$0xff]   ;;  %v850_v2 = vld [vmem:[%s1174_s3 + $0x38] sm:$0xff]   ;;  %s1184_s7 = smov (!%p220_p10, %s685_s7), 31  ;;  %vm274_vm0 = vcmask 261120  }
  0x14   : > { %739 = vmatprep.subr.bf16.mxu0 %v848_v0  ;;  %v851_v3 = vld [vmem:[%s1174_s3 + $0x30] sm:$0xff]   ;;  %791 = vmatprep.subr.bf16.mxu1 %v850_v2  ;;  %s686_s14 = sshll.u32 %s1184_s7, 3  ;;  %v852_v28 = vld [vmem:[%s1174_s3 + $0x28] sm:$0xff]   ;;  %v853_v29 = vld [vmem:[%s1174_s3 + $0x20] sm:$0xff]  }
  0x15   : > { %740 = vmatpush3.bf16.msra.mxu0 %v848_v0  ;;  %799 = vmatpush3.bf16.msra.mxu1 %v850_v2  ;;  %s1049_s17 = scalar_lea.vmem %s1171_s0, %s686_s14  ;;  %v854_v30 = vld [vmem:[%s1174_s3 + $0x18] sm:$0xff]   ;;  %v855_v31 = vld [vmem:[%s1174_s3 + $0x10] sm:$0xff]   ;;  %v856_v32 = vld [vmem:[%s1174_s3 + $0x8] sm:$0xff]  }
  0x16   : > { %741 = vmatprep.subr.bf16.mxu0 %v849_v1  ;;  %792 = vmatprep.subr.bf16.mxu1 %v851_v3  ;;  %v227_v4 = vld [vmem:[%s1049_s17] sm:$0xff]  ;;  %v228_v5 = vld [vmem:[%s1049_s17 + $0x8] sm:$0xff]  ;;  %v229_v6 = vld [vmem:[%s1049_s17 + $0x10] sm:$0xff] }
  0x17   : > { %v243_v7 = vpack.c.bf16 %v228_v5, %v227_v4  ;;  %v230_v8 = vld [vmem:[%s1049_s17 + $0x18] sm:$0xff]  ;;  %v231_v9 = vld [vmem:[%s1049_s17 + $0x20] sm:$0xff]  ;;  %v232_v10 = vld [vmem:[%s1049_s17 + $0x28] sm:$0xff] }
  0x18   : > { %v244_v11 = vpack.c.bf16 %v230_v8, %v229_v6  ;;  %v245_v12 = vpack.c.bf16 %v232_v10, %v231_v9  ;;  %v233_v13 = vld [vmem:[%s1049_s17 + $0x30] sm:$0xff]  ;;  %v234_v14 = vld [vmem:[%s1049_s17 + $0x38] sm:$0xff]  ;;  %v235_v15 = vld [vmem:[%s1049_s17 + $0x40] sm:$0xff] }
  0x19   : > { %742 = vmatpush3.bf16.msra.mxu0 %v849_v1  ;;  %800 = vmatpush3.bf16.msra.mxu1 %v851_v3  ;;  %v236_v16 = vld [vmem:[%s1049_s17 + $0x48] sm:$0xff]  ;;  %v246_v17 = vpack.c.bf16 %v234_v14, %v233_v13  ;;  %v237_v19 = vld [vmem:[%s1049_s17 + $0x50] sm:$0xff]  ;;  %v238_v20 = vld [vmem:[%s1049_s17 + $0x58] sm:$0xff] }
  0x1a   : > { %759 = vmatprep.subr.bf16.mxu0 %v850_v2  ;;  %743 = vmatprep.mubr.msk.bf16.mxu0 %vm274_vm0, %v243_v7  ;;  %v247_v18 = vpack.c.bf16 %v236_v16, %v235_v15  ;;  %v239_v21 = vld [vmem:[%s1049_s17 + $0x60] sm:$0xff]  ;;  %v240_v22 = vld [vmem:[%s1049_s17 + $0x68] sm:$0xff]  ;;  %v248_v23 = vpack.c.bf16 %v238_v20, %v237_v19  ;;  %v241_v25 = vld [vmem:[%s1049_s17 + $0x70] sm:$0xff] }
  0x1b   : > { %v249_v24 = vpack.c.bf16 %v240_v22, %v239_v21  ;;  %v242_v26 = vld [vmem:[%s1049_s17 + $0x78] sm:$0xff]  ;;  %793 = vmatprep.subr.bf16.mxu1 %v852_v28  ;;  %v857_v33 = vld [vmem:[%s1174_s3] sm:$0xff]   ;;  %s684_s17 = sshll.u32 %s216_s16, 7 }
  0x1c   : > { %744 = vmatmul.mubr.msk.bf16.vlgmr.msra.gmra.mxu0 %vm274_vm0, %v244_v11  ;;  %v250_v27 = vpack.c.bf16 %v242_v26, %v241_v25  ;;  %v687_v35 = vld [vmem:[%s1173_s2] ss:$0 sm:$0xff]  ;;  %s1102_s26 = scalar_lea.vmem [#allocation2], %s684_s17 }
  0x1d   : > { %747 = vmatprep.mubr.msk.bf16.mxu0 %vm274_vm0, %v245_v12  ;;  %760 = vmatpush3.bf16.msra.mxu0 %v850_v2  ;;  %s618_s6 = sshll.u32 %s1102_s26, 4  ;;  %s1125_s6 = int_to_ptr.vmem [resolvable:$true] %s618_s6 }
  0x1e   : > { %761 = vmatprep.subr.bf16.mxu0 %v851_v3  ;;  %801 = vmatpush3.bf16.msra.mxu1 %v852_v28  ;;  %s890_s10 = scalar_lea.vmem %s1125_s6, 2048  ;;  %p897_p0 = scmp.lt.s32.totalorder %s1125_s6, %s895_s12 }
  0x1f   : > { %794 = vmatprep.subr.bf16.mxu1 %v853_v29  ;;  %p891_p11 = scmp.ne.s32.totalorder %s1125_s6, %s890_s10  ;;  %p898_p1 = scmp.lt.s32.totalorder %s896_s13, %s890_s10 }
  0x21   : > { %762 = vmatpush3.bf16.msra.mxu0 %v851_v3  ;;  %p892_p12 = pnand %p891_p11, %p1023_p5  ;;  %p899_p2 = por %p898_p1, %p897_p0 }
  0x22   : > { %763 = vmatprep.subr.bf16.mxu0 %v852_v28  ;;  %802 = vmatpush3.bf16.msra.mxu1 %v853_v29 }
  0x23   : > { %795 = vmatprep.subr.bf16.mxu1 %v854_v30  ;;  %p893_p13 = pneg %p892_p12 }
  0x24   : > { %748 = vmatmul.mubr.msk.bf16.gmra.mxu0 %vm274_vm0, %v246_v17 }
  0x25   : > { %751 = vmatprep.mubr.msk.bf16.mxu0 %vm274_vm0, %v247_v18  ;;  %764 = vmatpush3.bf16.msra.mxu0 %v852_v28  ;;  %p900_p3 = pnand %p899_p2, %p893_p13 }
  0x26   : > { %765 = vmatprep.subr.bf16.mxu0 %v853_v29  ;;  %803 = vmatpush3.bf16.msra.mxu1 %v854_v30 }
  0x27   : > { %796 = vmatprep.subr.bf16.mxu1 %v855_v31 }
  0x29   : > { %766 = vmatpush3.bf16.msra.mxu0 %v853_v29 }
  0x2a   : > { %767 = vmatprep.subr.bf16.mxu0 %v854_v30  ;;  %804 = vmatpush3.bf16.msra.mxu1 %v855_v31 }
  0x2b   : > { %797 = vmatprep.subr.bf16.mxu1 %v856_v32 }
  0x2c   : > { %752 = vmatmul.mubr.msk.bf16.gmra.mxu0 %vm274_vm0, %v248_v23 }
  0x2d   : > { %755 = vmatprep.mubr.msk.bf16.mxu0 %vm274_vm0, %v249_v24  ;;  %768 = vmatpush3.bf16.msra.mxu0 %v854_v30 }
  0x2e   : > { %769 = vmatprep.subr.bf16.mxu0 %v855_v31  ;;  %805 = vmatpush3.bf16.msra.mxu1 %v856_v32 }
  0x2f   : > { %798 = vmatprep.subr.bf16.mxu1 %v857_v33 }
  0x31   : > { %770 = vmatpush3.bf16.msra.mxu0 %v855_v31 }
  0x32   : > { %771 = vmatprep.subr.bf16.mxu0 %v856_v32  ;;  %806 = vmatpush3.bf16.msra.mxu1 %v857_v33 }
  0x34   : > { %756 = vmatmul.mubr.msk.bf16.gmra.mxu0 %vm274_vm0, %v250_v27  ;;  %v698_v27 = vld [vmem:[%s1175_s4] ss:$0 sm:$0xff] }
  0x35   : > { %772 = vmatpush3.bf16.msra.mxu0 %v856_v32 }
  0x36   : > { %773 = vmatprep.subr.bf16.mxu0 %v857_v33 }
  0x39   : > { %774 = vmatpush3.bf16.msra.mxu0 %v857_v33 }
  0xdc   : > { %v745_v34 = vpop.f32.mrf.mxu0 }
  0xdd   : > { %v342_v40 = vadd.f32 %v745_v34, %v687_v35 }
  0xde   : > { %v333_v36 = vpop.f32.mrf.mxu0 }
  0xdf   : > { %v334_v37 = vadd.f32 %v687_v35, %v333_v36 }
  0xe0   : > { %v746_v38 = vpop.f32.mrf.mxu0 }
  0xe1   : > { %v345_v39 = vadd.f32 %v746_v38, %v687_v35  ;;  %858 = vtanh.f32 %v334_v37 }
  0xe2   : > { %v336_v41 = vpop.f32.mrf.mxu0 }
  0xe3   : > { %v337_v42 = vadd.f32 %v687_v35, %v336_v41  ;;  %860 = vtanh.f32 %v345_v39 }
  0xe4   : > { %v749_v43 = vpop.f32.mrf.mxu0 }
  0xe5   : > { %862 = vtanh.f32 %v337_v42  ;;  %v358_v48 = vadd.f32 %v749_v43, %v687_v35 }
  0xe6   : > { %864 = vtanh.f32 %v342_v40  ;;  %v349_v44 = vpop.f32.mrf.mxu0 }
  0xe7   : > { %v350_v45 = vadd.f32 %v687_v35, %v349_v44 }
  0xe8   : > { %v750_v46 = vpop.f32.mrf.mxu0 }
  0xe9   : > { %v361_v47 = vadd.f32 %v750_v46, %v687_v35  ;;  %866 = vtanh.f32 %v350_v45 }
  0xea   : > { %v352_v49 = vpop.f32.mrf.mxu0 }
  0xeb   : > { %v353_v50 = vadd.f32 %v687_v35, %v352_v49  ;;  %868 = vtanh.f32 %v361_v47 }
  0xec   : > { %v753_v51 = vpop.f32.mrf.mxu0 }
  0xed   : > { %870 = vtanh.f32 %v353_v50  ;;  %v374_v59 = vadd.f32 %v753_v51, %v687_v35 }
  0xee   : > { %872 = vtanh.f32 %v358_v48  ;;  %v365_v52 = vpop.f32.mrf.mxu0  ;;  %v859_v54 = vpop.eup %858 }
  0xef   : > { %v366_v53 = vadd.f32 %v687_v35, %v365_v52 }
  0xf0   : > { %v754_v55 = vpop.f32.mrf.mxu0  ;;  %v861_v56 = vpop.eup %860 }
  0xf1   : > { %v377_v57 = vadd.f32 %v754_v55, %v687_v35  ;;  %874 = vtanh.f32 %v366_v53 }
  0xf2   : > { %v863_v58 = vpop.eup %862  ;;  %v368_v60 = vpop.f32.mrf.mxu0 }
  0xf3   : > { %v865_v61 = vpop.eup %864  ;;  %v369_v62 = vadd.f32 %v687_v35, %v368_v60  ;;  %v412_v63 = vpack.c.bf16 %v863_v58, %v859_v54  ;;  %876 = vtanh.f32 %v377_v57 }
  0xf4   : > { %v757_v0 = vpop.f32.mrf.mxu0  ;;  %v413_v1 = vpack.c.bf16 %v861_v56, %v865_v61 }
  0xf5   : > { %878 = vtanh.f32 %v369_v62  ;;  %775 = vmatprep.mubr.bf16.mxu0 %v412_v63  ;;  %v390_v9 = vadd.f32 %v757_v0, %v687_v35 }
  0xf6   : > { %880 = vtanh.f32 %v374_v59  ;;  %v381_v2 = vpop.f32.mrf.mxu0  ;;  %776 = vmatmul.mubr.bf16.vlgmr.msra.gmra.mxu0 %v413_v1  ;;  %v867_v4 = vpop.eup %866 }
  0xf7   : > { %v382_v3 = vadd.f32 %v687_v35, %v381_v2 }
  0xf8   : > { %v758_v5 = vpop.f32.mrf.mxu0  ;;  %v869_v6 = vpop.eup %868 }
  0xf9   : > { %v393_v7 = vadd.f32 %v758_v5, %v687_v35  ;;  %882 = vtanh.f32 %v382_v3 }
  0xfa   : > { %v871_v8 = vpop.eup %870  ;;  %v384_v10 = vpop.f32.mrf.mxu0 }
  0xfb   : > { %v873_v11 = vpop.eup %872  ;;  %v385_v12 = vadd.f32 %v687_v35, %v384_v10  ;;  %v414_v13 = vpack.c.bf16 %v871_v8, %v867_v4  ;;  %884 = vtanh.f32 %v393_v7 }
  0xfc   : > { %v415_v14 = vpack.c.bf16 %v869_v6, %v873_v11 }
  0xfd   : > { %886 = vtanh.f32 %v385_v12  ;;  %779 = vmatprep.mubr.bf16.mxu1 %v414_v13 }
  0xfe   : > { %888 = vtanh.f32 %v390_v9  ;;  %780 = vmatmul.mubr.bf16.vlgmr.msra.gmra.mxu1 %v415_v14  ;;  %v875_v15 = vpop.eup %874 }
 0x100   : > { %v877_v16 = vpop.eup %876 }
 0x102   : > { %v879_v17 = vpop.eup %878 }
 0x103   : > { %v881_v18 = vpop.eup %880  ;;  %v416_v19 = vpack.c.bf16 %v879_v17, %v875_v15 }
 0x104   : > { %v417_v20 = vpack.c.bf16 %v877_v16, %v881_v18 }
 0x105   : > { %783 = vmatprep.mubr.bf16.mxu1 %v416_v19 }
 0x106   : > { %784 = vmatmul.mubr.bf16.gmra.mxu1 %v417_v20  ;;  %v883_v21 = vpop.eup %882 }
 0x108   : > { %v885_v22 = vpop.eup %884 }
 0x10a   : > { %v887_v23 = vpop.eup %886 }
 0x10b   : > { %v889_v24 = vpop.eup %888  ;;  %v418_v25 = vpack.c.bf16 %v887_v23, %v883_v21 }
 0x10c   : > { %v419_v26 = vpack.c.bf16 %v885_v22, %v889_v24 }
 0x10d   : > { %787 = vmatprep.mubr.bf16.mxu1 %v418_v25 }
 0x10e   : > { %788 = vmatmul.mubr.bf16.gmra.mxu1 %v419_v26 }
 0x1b6   : > { %v777_v28 = vpop.f32.mrf.mxu0 }
 0x1b7   : > { %v534_v29 = vadd.f32 %v777_v28, %v698_v27 }
 0x1b8   : > { %v525_v30 = vpop.f32.mrf.mxu0 }
 0x1b9   : > { %590 = vst [vmem:[%s1102_s26 + $0x10] sm:$0xff] %v534_v29  ;;  %v526_v31 = vadd.f32 %v698_v27, %v525_v30 }
 0x1ba   : > { %v778_v32 = vpop.f32.mrf.mxu0 }
 0x1bb   : > { %588 = vst [vmem:[%s1102_s26] sm:$0xff] %v526_v31  ;;  %v537_v33 = vadd.f32 %v778_v32, %v698_v27 }
 0x1bc   : > { %v528_v34 = vpop.f32.mrf.mxu0 }
 0x1bd   : > { %591 = vst [vmem:[%s1102_s26 + $0x18] sm:$0xff] %v537_v33  ;;  %v529_v35 = vadd.f32 %v698_v27, %v528_v34 }
 0x1be   : > { %v781_v36 = vpop.f32.mrf.mxu1 }
 0x1bf   : > { %589 = vst [vmem:[%s1102_s26 + $0x8] sm:$0xff] %v529_v35  ;;  %v550_v37 = vadd.f32 %v781_v36, %v698_v27 }
 0x1c0   : > { %v541_v38 = vpop.f32.mrf.mxu1 }
 0x1c1   : > { %594 = vst [vmem:[%s1102_s26 + $0x30] sm:$0xff] %v550_v37  ;;  %v542_v39 = vadd.f32 %v698_v27, %v541_v38 }
 0x1c2   : > { %v782_v40 = vpop.f32.mrf.mxu1 }
 0x1c3   : > { %592 = vst [vmem:[%s1102_s26 + $0x20] sm:$0xff] %v542_v39  ;;  %v553_v41 = vadd.f32 %v782_v40, %v698_v27 }
 0x1c4   : > { %v544_v42 = vpop.f32.mrf.mxu1 }
 0x1c5   : > { %595 = vst [vmem:[%s1102_s26 + $0x38] sm:$0xff] %v553_v41  ;;  %v545_v43 = vadd.f32 %v698_v27, %v544_v42 }
 0x1c6   : > { %v785_v44 = vpop.f32.mrf.mxu1 }
 0x1c7   : > { %593 = vst [vmem:[%s1102_s26 + $0x28] sm:$0xff] %v545_v43  ;;  %v566_v45 = vadd.f32 %v785_v44, %v698_v27 }
 0x1c8   : > { %v557_v46 = vpop.f32.mrf.mxu1 }
 0x1c9   : > { %598 = vst [vmem:[%s1102_s26 + $0x50] sm:$0xff] %v566_v45  ;;  %v558_v47 = vadd.f32 %v698_v27, %v557_v46 }
 0x1ca   : > { %v786_v48 = vpop.f32.mrf.mxu1 }
 0x1cb   : > { %596 = vst [vmem:[%s1102_s26 + $0x40] sm:$0xff] %v558_v47  ;;  %v569_v49 = vadd.f32 %v786_v48, %v698_v27 }
 0x1cc   : > { %v560_v50 = vpop.f32.mrf.mxu1 }
 0x1cd   : > { %599 = vst [vmem:[%s1102_s26 + $0x58] sm:$0xff] %v569_v49  ;;  %v561_v51 = vadd.f32 %v698_v27, %v560_v50 }
 0x1ce   : > { %v789_v52 = vpop.f32.mrf.mxu1 }
 0x1cf   : > { %597 = vst [vmem:[%s1102_s26 + $0x48] sm:$0xff] %v561_v51  ;;  %v582_v53 = vadd.f32 %v789_v52, %v698_v27 }
 0x1d0   : > { %v573_v54 = vpop.f32.mrf.mxu1 }
 0x1d1   : > { %602 = vst [vmem:[%s1102_s26 + $0x70] sm:$0xff] %v582_v53  ;;  %v574_v55 = vadd.f32 %v698_v27, %v573_v54 }
 0x1d2   : > { %v790_v56 = vpop.f32.mrf.mxu1 }
 0x1d3   : > { %600 = vst [vmem:[%s1102_s26 + $0x60] sm:$0xff] %v574_v55  ;;  %v585_v57 = vadd.f32 %v790_v56, %v698_v27 }
 0x1d4   : > { %v576_v58 = vpop.f32.mrf.mxu1 }
 0x1d5   : > { %603 = vst [vmem:[%s1102_s26 + $0x78] sm:$0xff] %v585_v57  ;;  %v577_v59 = vadd.f32 %v698_v27, %v576_v58 }
 0x1d7   : > { %601 = vst [vmem:[%s1102_s26 + $0x68] sm:$0xff] %v577_v59 }
 0x1d8   : > { %903 = shalt.err (!%p900_p3)
}
 0x1d9   : > { %s904_s14 = scalar_lea.hbm %s1123_s9, 2048  ;;  %s908_s17 = scalar_lea.hbm %s1176_s5, 4096 }
 0x1da   : > { %p905_p4 = scmp.ne.s32.totalorder %s1123_s9, %s904_s14  ;;  %p909_p9 = scmp.lt.s32.totalorder %s1123_s9, %s1176_s5 }
 0x1db   : > { %p910_p10 = scmp.lt.s32.totalorder %s908_s17, %s904_s14 }
 0x1dc   : > { %p906_p7 = pnand %p905_p4, %p1023_p5 }
 0x1dd   : > { %p911_p11 = por %p910_p10, %p909_p9 }
 0x1de   : > { %p907_p8 = pneg %p906_p7 }
 0x1e0   : > { %p912_p12 = pnand %p911_p11, %p907_p8 }
 0x1e2   : > { %915 = shalt.err (!%p912_p12)
}
 0x1e3   : > { %s953_s26 = smov 128   ;;  %s954_s30 = smov 8  }
 0x1e4   : > { %807 = dma.vmem_to_hbm [thread:$0]  (%p1023_p5), %s1125_s6, 2048, %s1123_s9, %s1131_s22, %s953_s26, %s953_s26, %s954_s30  }
 0x1e5 PF: > { %p813_p13 = scmp.ge.s32.totalorder %s950_s21, 2  ;;  %s633_s7 = sand.u32 1, %s938_s18  }
 0x1e6   : > { %s634_s8 = scalar_lea.sflag [#allocation3], %s633_s7 }
 0x1e7   : > { %p810_p0 = pnand %p813_p13, %p1027_p6 }
 0x1e9   : > { %p811_p1 = pneg %p810_p0 }
 0x1eb   : > { %933 = dma.done.wait (%p811_p1), %s634_s8, 2048  }
 0x1ec   : > { %935 = vsyncadd (%p811_p1), %s634_s8, 4294965248  ;;  %p15_p2 = scmp.ge.s32.totalorder %s1010_s24, 4   ;;  %s1179_s18 = smov %s942_s19 }
 0x1ed   : > { %s1180_s19 = smov %s946_s20  ;;  %s1181_s20 = smov %s1021_s27 }
 0x1ee   : > { %s1182_s21 = smov %s1010_s24  ;;  %17 = sbr.rel (!%p15_p2) target bundleno = 3 (0x3), region = 75 }
 0x1f3   :  { %639 = vsyncpa [#allocation3], 1 }
 0x1f4   :  { %641 = vsyncpa [#allocation3 + $0x1], 1 }

</bundles_post_ra>
